<compile_context>
chip_gen: v7x
topology: tpu7x:2x2x1
jax: 0.10.0
libtpu: 0.0.40
codegen_flags: <defaults>
</compile_context>

<pallas_src>
import jax
import jax.numpy as jnp
from jax.experimental import pallas as pl
from jax.experimental.pallas import tpu as pltpu


def make_freq_bands(N_freqs: int, logscale: bool = True):
    """Static Python-float frequency bands matching the torch module."""
    if logscale:
        # 2 ** linspace(0, N-1, N) == exact powers of two
        return tuple(float(2.0 ** k) for k in range(N_freqs))
    if N_freqs == 1:
        return (1.0,)
    hi = 2.0 ** (N_freqs - 1)
    return tuple(1.0 + i * (hi - 1.0) / (N_freqs - 1) for i in range(N_freqs))


def _round_up(x: int, m: int) -> int:
    return ((x + m - 1) // m) * m


def _embedding_kernel_factory(freqs, identity: bool, C: int):
    # freqs: tuple of Python floats (compile-time constants baked into kernel).
    def kernel(x_ref, o_ref):
        # x_ref: (C, TILE_B) channel-major tile; batch lives on the lane axis.
        x = x_ref[...].astype(jnp.float32)          # f32 compute on every gen
        base = 0
        if identity:
            o_ref[0:C, :] = x.astype(o_ref.dtype)
            base = C
        # sin/cos run on the EUP; stores are full lane-width.
        # TODO(synk): if this ever becomes EUP-bound (v7x + bf16 out, large
        # N_freqs), switch logscale path to the double-angle recurrence.
        for f in freqs:
            fx = f * x
            o_ref[base:base + C, :] = jnp.sin(fx).astype(o_ref.dtype)
            o_ref[base + C:base + 2 * C, :] = jnp.cos(fx).astype(o_ref.dtype)
            base += 2 * C
    return kernel


def embedding_forward(x, N_freqs, logscale=True, identity=True,
                      tile_b=1024, out_dtype=None):
    """Pallas wrapper matching Embedding.forward semantics.

    x: (B, in_channels) -> (B, in_channels * (2*N_freqs + identity))
    """
    B, C = x.shape
    out_dtype = x.dtype if out_dtype is None else jnp.dtype(out_dtype)
    n_parts = 2 * N_freqs + (1 if identity else 0)
    out_channels = C * n_parts

    assert tile_b % 128 == 0, "tile_b must be a multiple of 128 (lane width)"
    # Shrink the tile for small batches; keep it a multiple of 128.
    tile_b_eff = min(tile_b, _round_up(B, 128))
    B_pad = _round_up(B, tile_b_eff)

    # Layout plumbing: pad batch and go channel-major so batch is lane-dense.
    x_t = jnp.pad(x, ((0, B_pad - B), (0, 0))).T          # (C, B_pad)

    freqs = make_freq_bands(N_freqs, logscale)
    kernel = _embedding_kernel_factory(freqs, identity, C)

    # VMEM budget: 2x double-buffered (in + out) blocks, with headroom; clamp
    # to 64 MiB so the same choice is valid on v7x / v6e / v5e.
    in_bytes = C * tile_b_eff * x.dtype.itemsize
    out_bytes = out_channels * tile_b_eff * jnp.dtype(out_dtype).itemsize
    vmem_bytes = int(min(64 * 1024 * 1024,
                         max(16 * 1024 * 1024, 4 * (in_bytes + out_bytes))))

    out_t = pl.pallas_call(
        kernel,
        out_shape=jax.ShapeDtypeStruct((out_channels, B_pad), out_dtype),
        grid_spec=pltpu.PrefetchScalarGridSpec(
            num_scalar_prefetch=0,
            grid=(B_pad // tile_b_eff,),
            in_specs=[pl.BlockSpec((C, tile_b_eff), lambda i: (0, i))],
            out_specs=pl.BlockSpec((out_channels, tile_b_eff), lambda i: (0, i)),
        ),
        compiler_params=pltpu.CompilerParams(
            dimension_semantics=("parallel",),
            vmem_limit_bytes=vmem_bytes,
        ),
    )(x_t)

    # Back to the PyTorch (B, out_channels) contract; drop batch padding.
    return out_t.T[:B]


def embedding_reference(x, N_freqs, logscale=True, identity=True):
    """Pure-JAX reference mirroring the PyTorch forward (torch.cat ordering)."""
    freqs = make_freq_bands(N_freqs, logscale)
    out = [x] if identity else []
    for f in freqs:
        out.append(jnp.sin(f * x))
        out.append(jnp.cos(f * x))
    return jnp.concatenate(out, axis=-1)


if __name__ == "__main__":
    key = jax.random.PRNGKey(0)
    B, in_channels, N_freqs = 8, 3, 4   # out_channels = 3 * (2*4 + 1) = 27

    x = jax.random.normal(key, (B, in_channels), dtype=jnp.float32)

    out = embedding_forward(x, N_freqs, logscale=True, identity=True)
    out = jax.block_until_ready(out)
    ref = embedding_reference(x, N_freqs, logscale=True, identity=True)
    assert out.shape == (B, in_channels * (2 * N_freqs + 1)), out.shape
    assert jnp.allclose(out, ref, atol=1e-5, rtol=1e-5), "mismatch vs reference"

    # Exercise the multi-tile / padded path (grid > 1, B not a multiple of 128).
    key2 = jax.random.PRNGKey(1)
    x2 = jax.random.normal(key2, (300, in_channels), dtype=jnp.float32)
    out2 = embedding_forward(x2, N_freqs, logscale=True, identity=True,
                             tile_b=256)
    out2 = jax.block_until_ready(out2)
    ref2 = embedding_reference(x2, N_freqs, logscale=True, identity=True)
    assert out2.shape == (300, in_channels * (2 * N_freqs + 1)), out2.shape
    assert jnp.allclose(out2, ref2, atol=1e-5, rtol=1e-5), "multi-tile mismatch"

    print("KERNEL_OK")
</pallas_src>

<mosaic_0001>
module attributes {stable_mosaic.version = 11 : i64} {
  func.func @kernel(%arg0: i32, %arg1: memref<3x128xf32, #tpu.memory_space<vmem>>, %arg2: memref<27x128xf32, #tpu.memory_space<vmem>>) attributes {dimension_semantics = [#tpu.dimension_semantics<parallel>], iteration_bounds = array<i64: 1>, scalar_prefetch = 0 : i64, scratch_operands = 0 : i64, tpu.core_type = #tpu.core_type<tc>, window_params = [{transform_indices = @transform_0, window_bounds = array<i64: 3, 128>}, {transform_indices = @transform_1, window_bounds = array<i64: 27, 128>}]} {
    %c0 = arith.constant 0 : index
    %c0_0 = arith.constant 0 : index
    %0 = vector.load %arg1[%c0, %c0_0] : memref<3x128xf32, #tpu.memory_space<vmem>>, vector<3x128xf32>
    %c0_1 = arith.constant 0 : index
    %c0_2 = arith.constant 0 : index
    %1 = vector.load %arg2[%c0_1, %c0_2] : memref<27x128xf32, #tpu.memory_space<vmem>>, vector<3x128xf32>
    tpu.vector_store %arg2[%c0_1, %c0_2], %0 {strides = array<i32>} : memref<27x128xf32, #tpu.memory_space<vmem>>, vector<3x128xf32>,
    %cst = arith.constant 1.000000e+00 : f32
    %2 = vector.broadcast %cst : f32 to vector<3x128xf32>
    %3 = arith.mulf %2, %0 : vector<3x128xf32>
    %4 = math.sin %3 : vector<3x128xf32>
    %c3 = arith.constant 3 : index
    %c0_3 = arith.constant 0 : index
    %5 = vector.load %arg2[%c3, %c0_3] : memref<27x128xf32, #tpu.memory_space<vmem>>, vector<3x128xf32>
    tpu.vector_store %arg2[%c3, %c0_3], %4 {strides = array<i32>} : memref<27x128xf32, #tpu.memory_space<vmem>>, vector<3x128xf32>,
    %6 = math.cos %3 : vector<3x128xf32>
    %c6 = arith.constant 6 : index
    %c0_4 = arith.constant 0 : index
    %7 = vector.load %arg2[%c6, %c0_4] : memref<27x128xf32, #tpu.memory_space<vmem>>, vector<3x128xf32>
    tpu.vector_store %arg2[%c6, %c0_4], %6 {strides = array<i32>} : memref<27x128xf32, #tpu.memory_space<vmem>>, vector<3x128xf32>,
    %cst_5 = arith.constant 2.000000e+00 : f32
    %8 = vector.broadcast %cst_5 : f32 to vector<3x128xf32>
    %9 = arith.mulf %8, %0 : vector<3x128xf32>
    %10 = math.sin %9 : vector<3x128xf32>
    %c9 = arith.constant 9 : index
    %c0_6 = arith.constant 0 : index
    %11 = vector.load %arg2[%c9, %c0_6] : memref<27x128xf32, #tpu.memory_space<vmem>>, vector<3x128xf32>
    tpu.vector_store %arg2[%c9, %c0_6], %10 {strides = array<i32>} : memref<27x128xf32, #tpu.memory_space<vmem>>, vector<3x128xf32>,
    %12 = math.cos %9 : vector<3x128xf32>
    %c12 = arith.constant 12 : index
    %c0_7 = arith.constant 0 : index
    %13 = vector.load %arg2[%c12, %c0_7] : memref<27x128xf32, #tpu.memory_space<vmem>>, vector<3x128xf32>
    tpu.vector_store %arg2[%c12, %c0_7], %12 {strides = array<i32>} : memref<27x128xf32, #tpu.memory_space<vmem>>, vector<3x128xf32>,
    %cst_8 = arith.constant 4.000000e+00 : f32
    %14 = vector.broadcast %cst_8 : f32 to vector<3x128xf32>
    %15 = arith.mulf %14, %0 : vector<3x128xf32>
    %16 = math.sin %15 : vector<3x128xf32>
    %c15 = arith.constant 15 : index
    %c0_9 = arith.constant 0 : index
    %17 = vector.load %arg2[%c15, %c0_9] : memref<27x128xf32, #tpu.memory_space<vmem>>, vector<3x128xf32>
    tpu.vector_store %arg2[%c15, %c0_9], %16 {strides = array<i32>} : memref<27x128xf32, #tpu.memory_space<vmem>>, vector<3x128xf32>,
    %18 = math.cos %15 : vector<3x128xf32>
    %c18 = arith.constant 18 : index
    %c0_10 = arith.constant 0 : index
    %19 = vector.load %arg2[%c18, %c0_10] : memref<27x128xf32, #tpu.memory_space<vmem>>, vector<3x128xf32>
    tpu.vector_store %arg2[%c18, %c0_10], %18 {strides = array<i32>} : memref<27x128xf32, #tpu.memory_space<vmem>>, vector<3x128xf32>,
    %cst_11 = arith.constant 8.000000e+00 : f32
    %20 = vector.broadcast %cst_11 : f32 to vector<3x128xf32>
    %21 = arith.mulf %20, %0 : vector<3x128xf32>
    %22 = math.sin %21 : vector<3x128xf32>
    %c21 = arith.constant 21 : index
    %c0_12 = arith.constant 0 : index
    %23 = vector.load %arg2[%c21, %c0_12] : memref<27x128xf32, #tpu.memory_space<vmem>>, vector<3x128xf32>
    tpu.vector_store %arg2[%c21, %c0_12], %22 {strides = array<i32>} : memref<27x128xf32, #tpu.memory_space<vmem>>, vector<3x128xf32>,
    %24 = math.cos %21 : vector<3x128xf32>
    %c24 = arith.constant 24 : index
    %c0_13 = arith.constant 0 : index
    %25 = vector.load %arg2[%c24, %c0_13] : memref<27x128xf32, #tpu.memory_space<vmem>>, vector<3x128xf32>
    tpu.vector_store %arg2[%c24, %c0_13], %24 {strides = array<i32>} : memref<27x128xf32, #tpu.memory_space<vmem>>, vector<3x128xf32>,
    return
  }
  func.func @transform_0(%arg0: i32) -> (i32, i32) {
    %c0_i32 = arith.constant 0 : i32
    %c0_i32_0 = arith.constant 0 : i32
    return %c0_i32, %arg0 : i32, i32
  }
  func.func @transform_1(%arg0: i32) -> (i32, i32) {
    %c0_i32 = arith.constant 0 : i32
    %c0_i32_0 = arith.constant 0 : i32
    return %c0_i32, %arg0 : i32, i32
  }
}

</mosaic_0001>

<bundles_post_ra>
// kernel: tpu_custom_call.1
= control target key start
LH: loop header
LB: loop body
LE: loop exit
PB: predicated region body
PF: predicated region fallthrough
CT: control target
= control target key end

     0   :  { %6 = vsyncpa [#allocation3], 0  ;;  %s1361_s0 = inlined_call_operand.hbm [shape: f32[3,128], index: 0, kind: input, shape index: {}]   ;;  %s1362_s1 = inlined_call_operand.hbm [shape: f32[27,128], index: 1, kind: output, shape index: {}]  }
   0x1   :  { %7 = vsyncpa [#allocation4], 0  ;;  %s1001_s6 = smov [#allocation2]   ;;  %s953_s10 = scalar_lea.hbm %s1361_s0, 64 }
   0x2   :  { %s14_s7 = sshll.u32 %s1001_s6, 4  ;;  %p954_p0 = scmp.ne.s32.totalorder %s1361_s0, %s953_s10  ;;  %s15_s7 = int_to_ptr.vmem [resolvable:$true] %s14_s7 }
   0x3   :  { %p957_p1 = scmp.lt.u32.totalorder %s953_s10, %s1361_s0 }
   0x5   :  { %p959_p2 = pnand %p957_p1, %p954_p0 }
   0x7   :  { %962 = shalt.err (!%p959_p2)
}
   0x8   :  { %s963_s15 = scalar_lea.vmem %s15_s7, 64  ;;  %p968_p4 = scmp.lt.s32.totalorder %s15_s7, %s15_s7 }
   0x9   :  { %p964_p3 = scmp.ne.s32.totalorder %s15_s7, %s963_s15  ;;  %p969_p5 = scmp.lt.s32.totalorder %s963_s15, %s963_s15 }
   0xb   :  { %p970_p6 = por %p969_p5, %p968_p4 }
   0xd   :  { %p971_p7 = pnand %p970_p6, %p964_p3 }
   0xf   :  { %974 = shalt.err (!%p971_p7)
}
  0x10   :  { %17 = dma.hbm_to_vmem [thread:$0]  %s1361_s0, 64, %s15_s7, [#allocation3]  }
  0x11   :  { %997 = dma.done.wait [#allocation3], 64  }
  0x12   :  { %998 = vsyncadd [#allocation3], 4294967232  ;;  %v1033_v0 = vld [vmem:[#allocation2] sm:$0x7]  ;;  %v1002_v26 = vmov 683565275  }
  0x13   :  { %22 = vst [vmem:[#allocation5] sm:$0x7] %v1033_v0  ;;  %v23_v1 = vand.u32 2147483647, %v1033_v0  ;;  %v26_v2 = vand.u32 2139095040, %v1033_v0  ;;  %v1039_v3 = vmul.f32 2.0, %v1033_v0 }
  0x14   :  { %v1042_v4 = vmul.f32 4.0, %v1033_v0  ;;  %v1003_v28 = vmov 2475754826   ;;  %v1004_v30 = vmov 2131351028   ;;  %vm25_vm13 = vcmp.lt.s32.totalorder %v1033_v0, 0 }
  0x15   :  { %v27_v5 = vshrl.u32 %v26_v2, 23  ;;  %v30_v6 = vand.u32 8388607, %v23_v1  ;;  %v233_v7 = vand.u32 2147483647, %v1039_v3  ;;  %v236_v8 = vand.u32 2139095040, %v1039_v3 }
  0x16   :  { %v446_v12 = vand.u32 2139095040, %v1042_v4  ;;  %v1005_v32 = vmov 2102212464   ;;  %v1006_v34 = vmov 920167782   ;;  %s1008_s0 = smov [#allocation5]  }
  0x17   :  { %v879_v9 = vadd.s32 4294967169, %v27_v5  ;;  %v237_v10 = vshrl.u32 %v236_v8, 23  ;;  %v240_v11 = vand.u32 8388607, %v233_v7  ;;  %v31_v14 = vor.u32 8388608, %v30_v6  ;;  %s867_s18 = sshll.u32 %s1008_s0, 4  ;;  %s868_s18 = int_to_ptr.vmem [resolvable:$true] %s867_s18 }
  0x18   :  { %v447_v17 = vshrl.u32 %v446_v12, 23  ;;  %v1007_v41 = vmov 1326507024   ;;  %vm1151_vm14 = vcmp.le.f32.partialorder %v23_v1, 0.7853982  ;;  %s975_s19 = scalar_lea.vmem %s868_s18, 512  ;;  %p980_p9 = scmp.lt.s32.totalorder %s868_s18, %s868_s18 }
  0x19   :  { %v33_v13 = vadd.s32 1, %v879_v9  ;;  %v887_v15 = vadd.s32 4294967169, %v237_v10  ;;  %v241_v16 = vor.u32 8388608, %v240_v11  ;;  %v1051_v22 = vshll.u32 %v31_v14, 8  ;;  %p976_p8 = scmp.ne.s32.totalorder %s868_s18, %s975_s19  ;;  %p981_p10 = scmp.lt.s32.totalorder %s975_s19, %s975_s19 }
  0x1a   :  { %v1055_v24 = vadd.s32 4294967169, %v447_v17 }
  0x1b   :  { %vm34_vm0 = vcmp.gt.s32.totalorder %v33_v13, 0  ;;  %v243_v19 = vadd.s32 1, %v887_v15  ;;  %v1053_v23 = vshll.u32 %v241_v16, 8  ;;  %p982_p11 = por %p981_p10, %p980_p9 }
  0x1c   :  { %v35_v18 = vsel %vm34_vm0, %v33_v13, 0 }
  0x1d   :  { %v36_v20 = vshrl.u32 %v35_v18, 5  ;;  %v37_v21 = vand.u32 31, %v35_v18  ;;  %vm244_vm1 = vcmp.gt.s32.totalorder %v243_v19, 0  ;;  %p983_p12 = pnand %p982_p11, %p976_p8 }
  0x1e   :  { %v245_v46 = vsel %vm244_vm1, %v243_v19, 0 }
  0x1f   :  { %v38_v25 = vsub.s32 32, %v37_v21  ;;  %v40_v27 = vshll.u32 %v1002_v26, %v37_v21  ;;  %v43_v29 = vshll.u32 %v1003_v28, %v37_v21  ;;  %v46_v31 = vshll.u32 %v1004_v30, %v37_v21 }
  0x20   :  { %v49_v33 = vshll.u32 %v1005_v32, %v37_v21  ;;  %v52_v35 = vshll.u32 %v1006_v34, %v37_v21  ;;  %vm55_vm2 = vcmp.lt.s32.totalorder %v36_v20, 1  ;;  %vm56_vm3 = vcmp.lt.s32.totalorder %v36_v20, 2 }
  0x21   :  { %v39_v36 = vshrl.u32 %v1002_v26, %v38_v25  ;;  %v41_v37 = vshrl.u32 %v1003_v28, %v38_v25  ;;  %v44_v38 = vshrl.u32 %v1004_v30, %v38_v25  ;;  %v47_v39 = vshrl.u32 %v1005_v32, %v38_v25 }
  0x22   :  { %v50_v40 = vshrl.u32 %v1006_v34, %v38_v25  ;;  %v53_v42 = vshrl.u32 %v1007_v41, %v38_v25  ;;  %vm57_vm4 = vcmp.lt.s32.totalorder %v36_v20, 3  ;;  %vm58_vm5 = vcmp.lt.s32.totalorder %v36_v20, 4 }
  0x23   :  { %v42_v43 = vor.u32 %v41_v37, %v40_v27  ;;  %v45_v44 = vor.u32 %v44_v38, %v43_v29  ;;  %v48_v45 = vor.u32 %v47_v39, %v46_v31  ;;  %v246_v49 = vshrl.u32 %v245_v46, 5 }
  0x24   :  { %v51_v47 = vor.u32 %v50_v40, %v49_v33  ;;  %v54_v48 = vor.u32 %v53_v42, %v52_v35  ;;  %v247_v50 = vand.u32 31, %v245_v46  ;;  %v453_v29 = vadd.s32 1, %v1055_v24 }
  0x25   :  { %v59_v51 = vsel %vm55_vm2, %v39_v36, %v42_v43  ;;  %v60_v52 = vsel %vm58_vm5, %v48_v45, 2102212464  ;;  %v63_v53 = vsel %vm55_vm2, %v42_v43, %v45_v44  ;;  %v67_v54 = vsel %vm55_vm2, %v45_v44, %v48_v45 }
  0x26   :  { %v61_v55 = vsel %vm57_vm4, %v45_v44, %v60_v52  ;;  %v64_v56 = vsel %vm58_vm5, %v51_v47, 920167782  ;;  %v68_v57 = vsel %vm58_vm5, %v54_v48, 1326507024  ;;  %v248_v58 = vsub.s32 32, %v247_v50 }
  0x27   :  { %v62_v59 = vsel %vm56_vm3, %v59_v51, %v61_v55  ;;  %v65_v60 = vsel %vm57_vm4, %v48_v45, %v64_v56  ;;  %v69_v61 = vsel %vm57_vm4, %v51_v47, %v68_v57  ;;  %v250_v62 = vshll.u32 %v1002_v26, %v247_v50 }
  0x28   :  { %v66_v63 = vsel %vm56_vm3, %v63_v53, %v65_v60  ;;  %v70_v2 = vsel %vm56_vm3, %v67_v54, %v69_v61  ;;  %v78_v5 = vmul.u32 %v1051_v22, %v62_v59  ;;  %v249_v6 = vshrl.u32 %v1002_v26, %v248_v58 }
  0x29   :  { %v1082_v8 = vmul.u32.u64.low %v1051_v22, %v70_v2  ;;  %v1083_v9 = vmul.u32.u64.high %v1051_v22, %v70_v2, %v1082_v8  ;;  %v1086_v10 = vmul.u32.u64.low %v1051_v22, %v66_v63  ;;  %v1087_v11 = vmul.u32.u64.high %v1051_v22, %v66_v63, %v1086_v10 }
  0x2a   :  { %v251_v12 = vshrl.u32 %v1003_v28, %v248_v58  ;;  %v253_v13 = vshll.u32 %v1003_v28, %v247_v50  ;;  %v254_v14 = vshrl.u32 %v1004_v30, %v248_v58  ;;  %v256_v15 = vshll.u32 %v1004_v30, %v247_v50 }
  0x2b   :  { %v257_v16 = vshrl.u32 %v1005_v32, %v248_v58  ;;  %v259_v17 = vshll.u32 %v1005_v32, %v247_v50  ;;  %v260_v18 = vshrl.u32 %v1006_v34, %v248_v58  ;;  %v262_v19 = vshll.u32 %v1006_v34, %v247_v50 }
  0x2c   :  { %v252_v20 = vor.u32 %v251_v12, %v250_v62  ;;  %v255_v21 = vor.u32 %v254_v14, %v253_v13  ;;  %v263_v22 = vshrl.u32 %v1007_v41, %v248_v58  ;;  %vm265_vm6 = vcmp.lt.s32.totalorder %v246_v49, 1 }
  0x2d   :  { %vm80_vm7 = vc.u32 %v1083_v9, %v1086_v10  ;;  %v81_v25 = vadd.s32 1, %v1087_v11  ;;  %v258_v27 = vor.u32 %v257_v16, %v256_v15  ;;  %v261_v31 = vor.u32 %v260_v18, %v259_v17 }
  0x2e   :  { %v264_v33 = vor.u32 %v263_v22, %v262_v19  ;;  %vm266_vm8 = vcmp.lt.s32.totalorder %v246_v49, 2  ;;  %vm267_vm9 = vcmp.lt.s32.totalorder %v246_v49, 3  ;;  %vm268_vm10 = vcmp.lt.s32.totalorder %v246_v49, 4 }
  0x2f   :  { %v82_v35 = vsel %vm80_vm7, %v81_v25, %v1087_v11  ;;  %v269_v36 = vsel %vm265_vm6, %v249_v6, %v252_v20  ;;  %v273_v37 = vsel %vm265_vm6, %v252_v20, %v255_v21  ;;  %v270_v39 = vsel %vm268_vm10, %v258_v27, 2102212464 }
  0x30   :  { %v83_v38 = vadd.s32 %v82_v35, %v78_v5  ;;  %v274_v40 = vsel %vm268_vm10, %v261_v31, 920167782  ;;  %v277_v42 = vsel %vm265_vm6, %v255_v21, %v258_v27  ;;  %v271_v43 = vsel %vm267_vm9, %v255_v21, %v270_v39 }
  0x31   :  { %v275_v44 = vsel %vm267_vm9, %v258_v27, %v274_v40  ;;  %v278_v45 = vsel %vm268_vm10, %v264_v33, 1326507024  ;;  %vm454_vm11 = vcmp.gt.s32.totalorder %v453_v29, 0  ;;  %v443_v48 = vand.u32 2147483647, %v1042_v4 }
  0x32   :  { %v84_v24 = vadd.s32 536870912, %v83_v38  ;;  %v276_v46 = vsel %vm266_vm8, %v273_v37, %v275_v44  ;;  %v279_v47 = vsel %vm267_vm9, %v261_v31, %v278_v45  ;;  %v272_v50 = vsel %vm266_vm8, %v269_v36, %v271_v43 }
  0x33   :  { %v280_v51 = vsel %vm266_vm8, %v277_v42, %v279_v47  ;;  %v1112_v52 = vmul.u32.u64.low %v1053_v23, %v276_v46  ;;  %v1113_v53 = vmul.u32.u64.high %v1053_v23, %v276_v46, %v1112_v52  ;;  %v455_v57 = vsel %vm454_vm11, %v453_v29, 0 }
  0x34   :  { %v85_v54 = vshrl.u32 %v84_v24, 30  ;;  %v1117_v55 = vmul.u32.u64.low %v1053_v23, %v280_v51  ;;  %v1118_v56 = vmul.u32.u64.high %v1053_v23, %v280_v51, %v1117_v55  ;;  %v457_v58 = vand.u32 31, %v455_v57 }
  0x35   :  { %v288_v60 = vmul.u32 %v1053_v23, %v272_v50  ;;  %v1122_v61 = vmul.f32 8.0, %v1033_v0  ;;  %v291_v49 = vadd.s32 1, %v1113_v53  ;;  %v450_v62 = vand.u32 8388607, %v443_v48 }
  0x36   :  { %v86_v59 = vshll.u32 %v85_v54, 30  ;;  %vm290_vm12 = vc.u32 %v1118_v56, %v1112_v52  ;;  %v458_v6 = vsub.s32 32, %v457_v58  ;;  %v109_v13 = vsub.s32 4, %v85_v54 }
  0x37   :  { %v653_v2 = vand.u32 2147483647, %v1122_v61  ;;  %v292_v5 = vsel %vm290_vm12, %v291_v49, %v1113_v53  ;;  %v451_v23 = vor.u32 8388608, %v450_v62  ;;  %v656_v14 = vand.u32 2139095040, %v1122_v61 }
  0x38   :  { %v87_v63 = vsub.s32 %v83_v38, %v86_v59  ;;  %v293_v11 = vadd.s32 %v292_v5, %v288_v60  ;;  %v460_v17 = vshll.u32 %v1002_v26, %v457_v58  ;;  %v461_v18 = vshrl.u32 %v1003_v28, %v458_v6 }
  0x39   :  { %v1134_v15 = vand.u32 8388607, %v653_v2  ;;  %v463_v19 = vshll.u32 %v1003_v28, %v457_v58  ;;  %v464_v21 = vshrl.u32 %v1004_v30, %v458_v6  ;;  %v466_v22 = vshll.u32 %v1004_v30, %v457_v58 }
  0x3a   :  { %v89_v8 = vsub.s32 0, %v87_v63  ;;  %v294_v16 = vadd.s32 536870912, %v293_v11  ;;  %v467_v25 = vshrl.u32 %v1005_v32, %v458_v6  ;;  %v79_v27 = vadd.s32 %v1086_v10, %v1083_v9 }
  0x3b   :  { %v1147_v31 = vshll.u32 %v451_v23, 8  ;;  %v456_v36 = vshrl.u32 %v455_v57, 5  ;;  %v469_v37 = vshll.u32 %v1005_v32, %v457_v58  ;;  %v470_v38 = vshrl.u32 %v1006_v34, %v458_v6 }
  0x3c   :  { %v880_v12 = vmin.u32 %v89_v8, %v87_v63  ;;  %v1145_v29 = vshrl.u32 %v294_v16, 30  ;;  %v110_v39 = vsel %vm25_vm13, %v109_v13, %v85_v54  ;;  %v657_v10 = vshrl.u32 %v656_v14, 23 }
  0x3d   :  { %v661_v40 = vor.u32 8388608, %v1134_v15  ;;  %v462_v42 = vor.u32 %v461_v18, %v460_v17  ;;  %v465_v1 = vor.u32 %v464_v21, %v463_v19  ;;  %v468_v43 = vor.u32 %v467_v25, %v466_v22 }
  0x3e   :  { %v91_v20 = vclz %v880_v12  ;;  %v296_v9 = vshll.u32 %v1145_v29, 30  ;;  %v472_v24 = vshll.u32 %v1006_v34, %v457_v58  ;;  %v473_v46 = vshrl.u32 %v1007_v41, %v458_v6 }
  0x3f   :  { %v471_v53 = vor.u32 %v470_v38, %v469_v37  ;;  %v459_v55 = vshrl.u32 %v1002_v26, %v458_v6  ;;  %vm475_vm0 = vcmp.lt.s32.totalorder %v456_v36, 1  ;;  %vm478_vm1 = vcmp.lt.s32.totalorder %v456_v36, 4 }
  0x40   :  { %v881_v35 = vadd.s32 4294967294, %v91_v20  ;;  %v1161_v45 = vsub.s32 %v293_v11, %v296_v9  ;;  %v289_v60 = vadd.s32 %v1112_v52, %v1118_v56  ;;  %v480_v49 = vsel %vm478_vm1, %v468_v43, 2102212464 }
  0x41   :  { %v474_v62 = vor.u32 %v473_v46, %v472_v24  ;;  %vm476_vm2 = vcmp.lt.s32.totalorder %v456_v36, 2  ;;  %vm477_vm3 = vcmp.lt.s32.totalorder %v456_v36, 3  ;;  %v483_v8 = vsel %vm475_vm0, %v462_v42, %v465_v1 }
  0x42   :  { %vm882_vm15 = vcmp.lt.s32.totalorder %v881_v35, 0  ;;  %v299_v54 = vsub.s32 0, %v1161_v45  ;;  %v484_v6 = vsel %vm478_vm1, %v471_v53, 920167782  ;;  %v112_v11 = vsel %vm1151_vm14, 0, %v110_v39 }
  0x43   :  { %v94_v44 = vsel %vm882_vm15, 0, %v881_v35  ;;  %vm235_vm4 = vcmp.lt.s32.totalorder %v1039_v3, 0  ;;  %v479_v52 = vsel %vm475_vm0, %v459_v55, %v462_v42  ;;  %v481_v56 = vsel %vm477_vm3, %v465_v1, %v480_v49 }
  0x44   :  { %v95_v47 = vsub.s32 32, %v94_v44  ;;  %v96_v50 = vshll.u32 %v87_v63, %v94_v44  ;;  %v99_v51 = vsub.s32 4294967266, %v94_v44  ;;  %v888_v58 = vmin.u32 %v299_v54, %v1161_v45 }
  0x45   :  { %v485_v14 = vsel %vm477_vm3, %v468_v43, %v484_v6  ;;  %v487_v16 = vsel %vm475_vm0, %v465_v1, %v468_v43  ;;  %v319_v18 = vsub.s32 4, %v1145_v29  ;;  %v488_v20 = vsel %vm478_vm1, %v474_v62, 1326507024 }
  0x46   :  { %v97_v57 = vshrl.u32 %v79_v27, %v95_v47  ;;  %v100_v59 = vadd.s32 127, %v99_v51  ;;  %v301_v23 = vclz %v888_v58  ;;  %v486_v19 = vsel %vm476_vm2, %v483_v8, %v485_v14 }
  0x47   :  { %vm1185_vm5 = vcmp.le.f32.partialorder %v233_v7, 0.7853982  ;;  %v489_v25 = vsel %vm477_vm3, %v471_v53, %v488_v20  ;;  %v1191_v27 = vmul.u32.u64.low %v1147_v31, %v486_v19  ;;  %v1192_v35 = vmul.u32.u64.high %v1147_v31, %v486_v19, %v1191_v27 }
  0x48   :  { %v98_v63 = vor.u32 %v97_v57, %v96_v50  ;;  %v101_v5 = vshll.u32 %v100_v59, 23  ;;  %v889_v17 = vadd.s32 4294967294, %v301_v23  ;;  %v482_v37 = vsel %vm476_vm2, %v479_v52, %v481_v56 }
  0x49   :  { %v490_v38 = vsel %vm476_vm2, %v487_v16, %v489_v25  ;;  %v903_v39 = vadd.s32 4294967169, %v657_v10  ;;  %v116_v50 = vadd.s32 3, %v112_v11  ;;  %v498_v51 = vmul.u32 %v1147_v31, %v482_v37 }
  0x4a   :  { %v102_v12 = vor.u32 4788187, %v101_v5  ;;  %v105_v13 = vcvt.s32.f32 %v98_v63  ;;  %vm890_vm6 = vcmp.lt.s32.totalorder %v889_v17, 0  ;;  %v501_v53 = vadd.s32 1, %v1192_v35 }
  0x4b   :  { %v304_v42 = vsel %vm890_vm6, 0, %v889_v17  ;;  %v1198_v7 = vmul.u32.u64.low %v1147_v31, %v490_v38  ;;  %v1199_v1 = vmul.u32.u64.high %v1147_v31, %v490_v38, %v1198_v7  ;;  %v663_v46 = vadd.s32 1, %v903_v39 }
  0x4c   :  { %v103_v21 = vand.u32 2147483647, %v102_v12  ;;  %v305_v43 = vsub.s32 32, %v304_v42  ;;  %v306_v44 = vshll.u32 %v1161_v45, %v304_v42  ;;  %v309_v24 = vsub.s32 4294967266, %v304_v42 }
  0x4d   :  { %v1204_v36 = vand.u32 3, %v112_v11  ;;  %vm664_vm7 = vcmp.gt.s32.totalorder %v663_v46, 0  ;;  %v320_v45 = vsel %vm235_vm4, %v319_v18, %v1145_v29  ;;  %vm500_vm8 = vc.u32 %v1199_v1, %v1191_v27 }
  0x4e   :  { %v106_v9 = vmul.f32 %v105_v13, %v103_v21  ;;  %v307_v10 = vshrl.u32 %v289_v60, %v305_v43  ;;  %v310_v54 = vadd.s32 127, %v309_v24  ;;  %v665_v57 = vsel %vm664_vm7, %v663_v46, 0 }
  0x4f   :  { %v502_v60 = vsel %vm500_vm8, %v501_v53, %v1192_v35  ;;  %v1217_v58 = vand.u32 3, %v116_v50  ;;  %v667_v63 = vand.u32 31, %v665_v57  ;;  %v322_v8 = vsel %vm1185_vm5, 0, %v320_v45 }
  0x50   :  { %v107_v47 = vxor.u32 2147483648, %v106_v9  ;;  %v308_v59 = vor.u32 %v307_v10, %v306_v44  ;;  %v311_v49 = vshll.u32 %v310_v54, 23  ;;  %v503_v62 = vadd.s32 %v502_v60, %v498_v51 }
  0x51   :  { %v668_v11 = vsub.s32 32, %v667_v63  ;;  %v670_v33 = vshll.u32 %v1002_v26, %v667_v63  ;;  %v673_v23 = vshll.u32 %v1003_v28, %v667_v63  ;;  %v676_v56 = vshll.u32 %v1004_v30, %v667_v63 }
  0x52   :  { %v108_v55 = vsel %vm25_vm13, %v107_v47, %v106_v9  ;;  %v312_v5 = vor.u32 4788187, %v311_v49  ;;  %v315_v29 = vcvt.s32.f32 %v308_v59  ;;  %v504_v6 = vadd.s32 536870912, %v503_v62 }
  0x53   :  { %v111_v31 = vsel %vm1151_vm14, %v1033_v0, %v108_v55  ;;  %v679_v12 = vshll.u32 %v1005_v32, %v667_v63  ;;  %v1226_v13 = vshll.u32 %v1006_v34, %v667_v63  ;;  %v1230_v16 = vshrl.u32 %v665_v57, 5 }
  0x54   :  { %937 = vcosq.f32 %v111_v31  ;;  %v313_v52 = vand.u32 2147483647, %v312_v5  ;;  %v1228_v14 = vshrl.u32 %v504_v6, 30  ;;  %v671_v17 = vshrl.u32 %v1003_v28, %v668_v11 }
  0x55   :  { %939 = vsinq.f32 %v111_v31  ;;  %v674_v18 = vshrl.u32 %v1004_v30, %v668_v11  ;;  %vm115_vm9 = vweird.f32 %v1033_v0  ;;  %v677_v20 = vshrl.u32 %v1005_v32, %v668_v11 }
  0x56   :  { %v316_v19 = vmul.f32 %v315_v29, %v313_v52  ;;  %v680_v21 = vshrl.u32 %v1006_v34, %v668_v11  ;;  %v683_v25 = vshrl.u32 %v1007_v41, %v668_v11  ;;  %v506_v35 = vshll.u32 %v1228_v14, 30 }
  0x57   :  { %v669_v37 = vshrl.u32 %v1002_v26, %v668_v11  ;;  %v672_v38 = vor.u32 %v671_v17, %v670_v33  ;;  %v675_v39 = vor.u32 %v674_v18, %v673_v23  ;;  %v678_v42 = vor.u32 %v677_v20, %v676_v56 }
  0x58   :  { %v317_v9 = vxor.u32 2147483648, %v316_v19  ;;  %v681_v28 = vor.u32 %v680_v21, %v679_v12  ;;  %v684_v30 = vor.u32 %v683_v25, %v1226_v13  ;;  %vm222_vm10 = vcmp.lt.s32.totalorder %v1204_v36, 2 }
  0x59   :  { %vm223_vm11 = vcmp.eq.s32.totalorder %v1204_v36, 0  ;;  %v326_v32 = vadd.s32 3, %v322_v8  ;;  %v1243_v7 = vsub.s32 %v503_v62, %v506_v35  ;;  %vm118_vm12 = vcmp.lt.s32.totalorder %v1217_v58, 2 }
  0x5a   :  { %vm226_vm13 = vcmp.eq.s32.totalorder %v1204_v36, 2  ;;  %v318_v26 = vsel %vm235_vm4, %v317_v9, %v316_v19  ;;  %v1249_v34 = vand.u32 3, %v322_v8  ;;  %vm122_vm14 = vcmp.eq.s32.totalorder %v1217_v58, 2 }
  0x5b   :  { %v321_v43 = vsel %vm1185_vm5, %v1039_v3, %v318_v26  ;;  %v509_v44 = vsub.s32 0, %v1243_v7  ;;  %vm685_vm15 = vcmp.lt.s32.totalorder %v1230_v16, 1  ;;  %vm119_vm0 = vcmp.eq.s32.totalorder %v1217_v58, 0 }
  0x5c   :  { %941 = vcosq.f32 %v321_v43  ;;  %v689_v47 = vsel %vm685_vm15, %v669_v37, %v672_v38  ;;  %v1260_v51 = vand.u32 3, %v326_v32  ;;  %vm436_vm1 = vcmp.eq.s32.totalorder %v1249_v34, 2 }
  0x5d   :  { %943 = vsinq.f32 %v321_v43  ;;  %v896_v53 = vmin.u32 %v509_v44, %v1243_v7  ;;  %vm688_vm2 = vcmp.lt.s32.totalorder %v1230_v16, 4  ;;  %v1269_v54 = vshll.u32 %v661_v40, 8 }
  0x5e   :  { %v938_v41 = vpop.eup %937  ;;  %vm433_vm3 = vcmp.eq.s32.totalorder %v1249_v34, 0  ;;  %v690_v31 = vsel %vm688_vm2, %v678_v42, 2102212464  ;;  %v499_v15 = vadd.s32 %v1191_v27, %v1199_v1  ;;  %vm687_vm4 = vcmp.lt.s32.totalorder %v1230_v16, 3 }
  0x5f   :  { %v940_v24 = vpop.eup %939  ;;  %v123_v46 = vxor.u32 2147483648, %v938_v41  ;;  %v511_v57 = vclz %v896_v53  ;;  %vm325_vm5 = vweird.f32 %v1039_v3  ;;  %vm686_vm6 = vcmp.lt.s32.totalorder %v1230_v16, 2 }
  0x60   :  { %v120_v50 = vxor.u32 2147483648, %v940_v24  ;;  %v691_v36 = vsel %vm687_vm4, %v675_v39, %v690_v31  ;;  %v693_v27 = vsel %vm685_vm15, %v672_v38, %v675_v39  ;;  %v694_v1 = vsel %vm688_vm2, %v681_v28, 920167782 }
  0x61   :  { %v124_v22 = vsel %vm122_vm14, %v123_v46, %v940_v24  ;;  %v228_v10 = vsel %vm226_vm13, %v123_v46, %v940_v24  ;;  %v897_v62 = vadd.s32 4294967294, %v511_v57  ;;  %v697_v0 = vsel %vm685_vm15, %v675_v39, %v678_v42 }
  0x62   :  { %v121_v55 = vsel %vm119_vm0, %v938_v41, %v120_v50  ;;  %v225_v45 = vsel %vm223_vm11, %v938_v41, %v120_v50  ;;  %v692_v58 = vsel %vm686_vm6, %v689_v47, %v691_v36  ;;  %v695_v63 = vsel %vm687_vm4, %v678_v42, %v694_v1 }
  0x63   :  { %v125_v59 = vsel %vm118_vm12, %v121_v55, %v124_v22  ;;  %v229_v49 = vsel %vm222_vm10, %v225_v45, %v228_v10  ;;  %vm898_vm7 = vcmp.lt.s32.totalorder %v897_v62, 0  ;;  %v698_v5 = vsel %vm688_vm2, %v684_v30, 1326507024 }
  0x64   :  { %v126_v40 = vsel %vm115_vm9, nan, %v125_v59  ;;  %v230_v60 = vsel %vm115_vm9, nan, %v229_v49  ;;  %vm332_vm8 = vcmp.eq.s32.totalorder %v1260_v51, 2  ;;  %v514_v29 = vsel %vm898_vm7, 0, %v897_v62 }
  0x65   :  { %127 = vst [vmem:[#allocation5 + $0x3] sm:$0x7] %v126_v40  ;;  %231 = vst [vmem:[#allocation5 + $0x6] sm:$0x7] %v230_v60  ;;  %v696_v8 = vsel %vm686_vm6, %v693_v27, %v695_v63  ;;  %v699_v6 = vsel %vm687_vm4, %v681_v28, %v698_v5  ;;  %v515_v11 = vsub.s32 32, %v514_v29  ;;  %v516_v33 = vshll.u32 %v1243_v7, %v514_v29 }
  0x66   :  { %v519_v23 = vsub.s32 4294967266, %v514_v29  ;;  %v700_v52 = vsel %vm686_vm6, %v697_v0, %v699_v6  ;;  %v942_v56 = vpop.eup %941  ;;  %v1316_v17 = vmul.u32.u64.low %v1269_v54, %v696_v8  ;;  %v1317_v18 = vmul.u32.u64.high %v1269_v54, %v696_v8, %v1316_v17 }
  0x67   :  { %v1312_v12 = vmul.u32.u64.low %v1269_v54, %v700_v52  ;;  %v1313_v13 = vmul.u32.u64.high %v1269_v54, %v700_v52, %v1312_v12  ;;  %v944_v19 = vpop.eup %943  ;;  %vm329_vm9 = vcmp.eq.s32.totalorder %v1260_v51, 0  ;;  %v333_v20 = vxor.u32 2147483648, %v942_v56 }
  0x68   :  { %v517_v21 = vshrl.u32 %v499_v15, %v515_v11  ;;  %v520_v25 = vadd.s32 127, %v519_v23  ;;  %vm328_vm10 = vcmp.lt.s32.totalorder %v1260_v51, 2  ;;  %v330_v35 = vxor.u32 2147483648, %v944_v19 }
  0x69   :  { %vm432_vm11 = vcmp.lt.s32.totalorder %v1249_v34, 2  ;;  %v708_v16 = vmul.u32 %v1269_v54, %v692_v58  ;;  %v334_v37 = vsel %vm332_vm8, %v333_v20, %v944_v19  ;;  %v438_v38 = vsel %vm436_vm1, %v333_v20, %v944_v19 }
  0x6a   :  { %v518_v39 = vor.u32 %v517_v21, %v516_v33  ;;  %v521_v9 = vshll.u32 %v520_v25, 23  ;;  %v331_v42 = vsel %vm329_vm9, %v942_v56, %v330_v35  ;;  %v435_v28 = vsel %vm433_vm3, %v942_v56, %v330_v35 }
  0x6b   :  { %v709_v30 = vadd.s32 %v1316_v17, %v1313_v13  ;;  %vm710_vm12 = vc.u32 %v1313_v13, %v1316_v17  ;;  %v335_v32 = vsel %vm328_vm10, %v331_v42, %v334_v37  ;;  %v439_v7 = vsel %vm432_vm11, %v435_v28, %v438_v38 }
  0x6c   :  { %v522_v26 = vor.u32 4788187, %v521_v9  ;;  %v525_v41 = vcvt.s32.f32 %v518_v39  ;;  %v336_v43 = vsel %vm325_vm5, nan, %v335_v32  ;;  %v440_v44 = vsel %vm325_vm5, nan, %v439_v7 }
  0x6d   :  { %v711_v24 = vadd.s32 1, %v1317_v18  ;;  %337 = vst [vmem:[#allocation5 + $0x9] sm:$0x7] %v336_v43  ;;  %441 = vst [vmem:[#allocation5 + $0xc] sm:$0x7] %v440_v44  ;;  %v529_v46 = vsub.s32 4, %v1228_v14  ;;  %vm535_vm6 = vweird.f32 %v1042_v4 }
  0x6e   :  { %v523_v34 = vand.u32 2147483647, %v522_v26  ;;  %vm445_vm13 = vcmp.lt.s32.totalorder %v1042_v4, 0  ;;  %vm444_vm14 = vcmp.le.f32.partialorder %v443_v48, 0.7853982  ;;  %vm655_vm7 = vcmp.lt.s32.totalorder %v1122_v61, 0 }
  0x6f   :  { %v712_v47 = vsel %vm710_vm12, %v711_v24, %v1317_v18  ;;  %v530_v3 = vsel %vm445_vm13, %v529_v46, %v1228_v14  ;;  %vm654_vm8 = vcmp.le.f32.partialorder %v653_v2, 0.7853982 }
  0x70   :  { %v526_v50 = vmul.f32 %v525_v41, %v523_v34  ;;  %v713_v51 = vadd.s32 %v712_v47, %v708_v16  ;;  %v532_v45 = vsel %vm444_vm14, 0, %v530_v3 }
  0x71   :  { %v536_v31 = vadd.s32 3, %v532_v45  ;;  %v641_v40 = vand.u32 3, %v532_v45 }
  0x72   :  { %v527_v53 = vxor.u32 2147483648, %v526_v50  ;;  %v714_v22 = vadd.s32 536870912, %v713_v51 }
  0x73   :  { %v537_v15 = vand.u32 3, %v536_v31  ;;  %vm646_vm0 = vcmp.eq.s32.totalorder %v641_v40, 2  ;;  %vm643_vm2 = vcmp.eq.s32.totalorder %v641_v40, 0  ;;  %vm642_vm4 = vcmp.lt.s32.totalorder %v641_v40, 2 }
  0x74   :  { %v528_v10 = vsel %vm445_vm13, %v527_v53, %v526_v50  ;;  %v715_v54 = vshrl.u32 %v714_v22, 30 }
  0x75   :  { %v531_v55 = vsel %vm444_vm14, %v1042_v4, %v528_v10  ;;  %vm542_vm15 = vcmp.eq.s32.totalorder %v537_v15, 2  ;;  %vm539_vm1 = vcmp.eq.s32.totalorder %v537_v15, 0  ;;  %vm538_vm3 = vcmp.lt.s32.totalorder %v537_v15, 2 }
  0x76   :  { %945 = vcosq.f32 %v531_v55  ;;  %v716_v57 = vshll.u32 %v715_v54, 30  ;;  %v739_v21 = vsub.s32 4, %v715_v54 }
  0x77   :  { %947 = vsinq.f32 %v531_v55 }
  0x78   :  { %v717_v59 = vsub.s32 %v713_v51, %v716_v57  ;;  %v740_v16 = vsel %vm655_vm7, %v739_v21, %v715_v54 }
  0x79   :  { %v742_v39 = vsel %vm654_vm8, 0, %v740_v16 }
  0x7a   :  { %v719_v49 = vsub.s32 0, %v717_v59  ;;  %v746_v9 = vadd.s32 3, %v742_v39  ;;  %v851_v28 = vand.u32 3, %v742_v39 }
  0x7c   :  { %v904_v60 = vmin.u32 %v719_v49, %v717_v59  ;;  %v747_v42 = vand.u32 3, %v746_v9  ;;  %vm856_vm10 = vcmp.eq.s32.totalorder %v851_v28, 2  ;;  %vm853_vm12 = vcmp.eq.s32.totalorder %v851_v28, 0 }
  0x7d   :  { %vm852_vm14 = vcmp.lt.s32.totalorder %v851_v28, 2 }
  0x7e   :  { %v721_v62 = vclz %v904_v60  ;;  %vm752_vm9 = vcmp.eq.s32.totalorder %v747_v42, 2  ;;  %vm749_vm11 = vcmp.eq.s32.totalorder %v747_v42, 0  ;;  %vm748_vm13 = vcmp.lt.s32.totalorder %v747_v42, 2 }
  0x80   :  { %v946_v48 = vpop.eup %945  ;;  %v905_v14 = vadd.s32 4294967294, %v721_v62 }
  0x81   :  { %v948_v36 = vpop.eup %947  ;;  %v543_v27 = vxor.u32 2147483648, %v946_v48 }
  0x82   :  { %v540_v1 = vxor.u32 2147483648, %v948_v36  ;;  %vm906_vm5 = vcmp.lt.s32.totalorder %v905_v14, 0 }
  0x83   :  { %v544_v0 = vsel %vm542_vm15, %v543_v27, %v948_v36  ;;  %v648_v58 = vsel %vm646_vm0, %v543_v27, %v948_v36  ;;  %v724_v63 = vsel %vm906_vm5, 0, %v905_v14  ;;  %vm745_vm15 = vweird.f32 %v1122_v61 }
  0x84   :  { %v541_v5 = vsel %vm539_vm1, %v946_v48, %v540_v1  ;;  %v645_v29 = vsel %vm643_vm2, %v946_v48, %v540_v1  ;;  %v725_v8 = vsub.s32 32, %v724_v63  ;;  %v726_v6 = vshll.u32 %v717_v59, %v724_v63 }
  0x85   :  { %v545_v11 = vsel %vm538_vm3, %v541_v5, %v544_v0  ;;  %v649_v33 = vsel %vm642_vm4, %v645_v29, %v648_v58  ;;  %v729_v23 = vsub.s32 4294967266, %v724_v63 }
  0x86   :  { %v546_v52 = vsel %vm535_vm6, nan, %v545_v11  ;;  %v650_v56 = vsel %vm535_vm6, nan, %v649_v33  ;;  %v727_v12 = vshrl.u32 %v709_v30, %v725_v8 }
  0x87   :  { %547 = vst [vmem:[#allocation5 + $0xf] sm:$0x7] %v546_v52  ;;  %651 = vst [vmem:[#allocation5 + $0x12] sm:$0x7] %v650_v56  ;;  %v730_v13 = vadd.s32 127, %v729_v23 }
  0x88   :  { %v728_v17 = vor.u32 %v727_v12, %v726_v6 }
  0x89   :  { %v731_v18 = vshll.u32 %v730_v13, 23 }
  0x8a   :  { %v735_v4 = vcvt.s32.f32 %v728_v17 }
  0x8b   :  { %v732_v19 = vor.u32 4788187, %v731_v18 }
  0x8d   :  { %v733_v20 = vand.u32 2147483647, %v732_v19 }
  0x8f   :  { %v736_v25 = vmul.f32 %v735_v4, %v733_v20 }
  0x91   :  { %v737_v35 = vxor.u32 2147483648, %v736_v25 }
  0x93   :  { %v738_v37 = vsel %vm655_vm7, %v737_v35, %v736_v25 }
  0x94   :  { %v741_v38 = vsel %vm654_vm8, %v1122_v61, %v738_v37 }
  0x95   :  { %949 = vcosq.f32 %v741_v38 }
  0x96   :  { %951 = vsinq.f32 %v741_v38 }
  0x9f   :  { %v950_v30 = vpop.eup %949 }
  0xa0   :  { %v952_v32 = vpop.eup %951  ;;  %v753_v7 = vxor.u32 2147483648, %v950_v30 }
  0xa1   :  { %v750_v2 = vxor.u32 2147483648, %v952_v32 }
  0xa2   :  { %v754_v26 = vsel %vm752_vm9, %v753_v7, %v952_v32  ;;  %v858_v41 = vsel %vm856_vm10, %v753_v7, %v952_v32 }
  0xa3   :  { %v751_v43 = vsel %vm749_vm11, %v950_v30, %v750_v2  ;;  %v855_v44 = vsel %vm853_vm12, %v950_v30, %v750_v2 }
  0xa4   :  { %v755_v24 = vsel %vm748_vm13, %v751_v43, %v754_v26  ;;  %v859_v34 = vsel %vm852_vm14, %v855_v44, %v858_v41 }
  0xa5   :  { %v756_v46 = vsel %vm745_vm15, nan, %v755_v24  ;;  %v860_v47 = vsel %vm745_vm15, nan, %v859_v34 }
  0xa6   :  { %757 = vst [vmem:[#allocation5 + $0x15] sm:$0x7] %v756_v46  ;;  %861 = vst [vmem:[#allocation5 + $0x18] sm:$0x7] %v860_v47 }
  0xa7   :  { %986 = shalt.err (!%p983_p12)
}
  0xa8   :  { %s987_s22 = scalar_lea.hbm %s1362_s1, 512 }
  0xa9   :  { %p988_p13 = scmp.ne.s32.totalorder %s1362_s1, %s987_s22  ;;  %p991_p0 = scmp.lt.u32.totalorder %s987_s22, %s1362_s1 }
  0xab   :  { %p993_p1 = pnand %p991_p0, %p988_p13 }
  0xad   :  { %996 = shalt.err (!%p993_p1)
}
  0xae   :  { %s1009_s27 = smov 128   ;;  %s1010_s28 = smov 8  }
  0xaf   :  { %873 = dma.vmem_to_hbm [thread:$0]  %s868_s18, 512, %s1362_s1, [#allocation4], %s1009_s27, %s1009_s27, %s1010_s28  }
  0xb0   :  { %999 = dma.done.wait [#allocation4], 512  }
  0xb1   :  { %1000 = vsyncadd [#allocation4], 4294966784 }
  0xb2   :  { %877 = vsyncpa [#allocation3], 1 }
  0xb3   :  { %878 = vsyncpa [#allocation4], 1 }

</bundles_post_ra>
